<compile_context>
chip_gen: v7x
topology: tpu7x:2x2x1
jax: 0.10.0
libtpu: 0.0.40
codegen_flags: <defaults>
</compile_context>

<pallas_src>
import functools

import jax
import jax.numpy as jnp
from jax import lax
from jax.experimental import pallas as pl
from jax.experimental.pallas import tpu as pltpu


def _se_kernel(x_ref, w1t_ref, b1_ref, w2_ref, b2_ref, o_ref, *, inv_hw, use_mxu):
    # x_ref: (Bt, C, HW) f32 -- channels on sublanes, spatial on lanes.
    x = x_ref[...]

    # ---- Squeeze: global average pool over the full (un-padded) spatial axis.
    # The block's last dim equals the logical H*W, so the reduction covers
    # exactly H*W elements; the compiler masks the physical lane padding of the
    # trailing partial vreg (no wrapper-side zero-pad, no user-level mask needed
    # because padded physical lanes are outside the logical array).
    pooled = jnp.sum(x, axis=-1) * inv_hw                                   # (Bt, C)

    if use_mxu:
        # Production path (C, hidden >= 128): MXU matmuls batched over Bt rows,
        # contracting dims chosen to match stored weight layouts (no in-kernel
        # transpose).
        h = lax.dot_general(pooled, w1t_ref[...], (((1,), (0,)), ((), ())),
                            preferred_element_type=jnp.float32) + b1_ref[...]   # (Bt, hidden)
        h = jnp.maximum(h, 0.0)
        s = lax.dot_general(h, w2_ref[...], (((1,), (1,)), ((), ())),
                            preferred_element_type=jnp.float32) + b2_ref[...]   # (Bt, C)
    else:
        # Tiny-FC path (this config: C=8, hidden=2): VPU broadcast-multiply +
        # cross-sublane/lane reduces; avoids MXU fill / result-FIFO latency for
        # near-empty tiles.
        # FC1: h[b, j] = sum_c pooled[b, c] * W1[j, c]   (w1t = W1^T: (C, hidden))
        h = jnp.sum(pooled[:, :, None] * w1t_ref[...][None, :, :], axis=1) \
            + b1_ref[...]                                                        # (Bt, hidden)
        h = jnp.maximum(h, 0.0)
        # FC2: s[b, c] = sum_j h[b, j] * W2[c, j]        (w2 stored as (C, hidden))
        s = jnp.sum(h[:, None, :] * w2_ref[...][None, :, :], axis=2) \
            + b2_ref[...]                                                        # (Bt, C)

    gate = jax.nn.sigmoid(s)                                                 # (Bt, C)

    # ---- Scale: per-(batch, channel) gate broadcast over the lane (spatial) axis.
    o_ref[...] = x * gate[:, :, None]


def _physical_vmem_bytes():
    """Physical VMEM of the current generation; conservative 64 MiB fallback."""
    try:
        info = pltpu.get_tpu_info()
        cap = int(getattr(info, "vmem_capacity_bytes", 0))
        if cap > 0:
            return cap
    except Exception:
        pass
    return 64 << 20  # v7x has 64 MiB; v5e/v6e have 128 MiB


def _choose_batch_tile(batch, slab_unit_bytes, param_bytes, vmem_cap):
    """Largest divisor Bt of `batch` such that:
      (a) the grid keeps >= 2 steps (v7x dual TensorCores; no-op on v5e/v6e),
      (b) the per-step x slab stays <= 8 MiB (HBM-roofline-sized DMAs),
      (c) 2x double-buffered in + 2x out slabs + params fit the VMEM cap."""
    best = 1
    for d in range(1, batch + 1):
        if batch % d:
            continue
        if batch >= 2 and (batch // d) < 2:
            continue
        slab = d * slab_unit_bytes
        if slab > (8 << 20):
            continue
        if 4 * slab + param_bytes + (2 << 20) > vmem_cap:
            continue
        best = d
    return best


def _se_block_impl(x, w1, b1, w2, b2, *, donate_x=False):
    """x: (B, C, H, W) f32 NCHW; w1: (hidden, C); b1: (hidden,); w2: (C, hidden); b2: (C,)."""
    B, C, H, W = x.shape
    HW = H * W
    hidden = w1.shape[0]

    # Merging contiguous trailing dims is a bitcast-style reshape: no HBM copy.
    x_flat = x.reshape(B, C, HW)

    # Hoist the weight transpose out of the kernel; w2 stays in its stored
    # (C, hidden) layout (contracted over hidden inside the kernel).
    w1t = w1.T                        # (C, hidden)
    b1_2d = b1.reshape(1, hidden)
    b2_2d = b2.reshape(1, C)

    use_mxu = (C >= 128) and (hidden >= 128)
    kernel = functools.partial(_se_kernel, inv_hw=1.0 / HW, use_mxu=use_mxu)

    # Generation-aware VMEM budget: ~75% of physical VMEM (~48 MiB on v7x,
    # ~96 MiB on v5e/v6e), always set explicitly (v5e's scoped default is 16 MiB).
    param_bytes = (2 * C * hidden + hidden + C) * 4
    slab_unit_bytes = C * HW * 4
    vmem_cap = (_physical_vmem_bytes() * 3) // 4
    bt = _choose_batch_tile(B, slab_unit_bytes, param_bytes, vmem_cap)
    # TODO(synk): if even bt=1 overflows the cap (very large C*H*W), add an
    # 'arbitrary' spatial-tile grid axis with a VMEM pooled accumulator
    # (pl.when init) followed by an FC + rescale pass over the same tiles.

    slab_bytes = bt * slab_unit_bytes
    vmem_limit = int(min(max(4 * slab_bytes + param_bytes + (2 << 20), 32 << 20),
                         vmem_cap))

    flops = 2 * B * C * HW + 4 * B * C * hidden          # pool + rescale + 2 FCs
    bytes_accessed = 2 * B * C * HW * 4 + param_bytes    # read x + write out + params

    # Alias only when the caller actually donates x at the jit boundary;
    # without real XLA donation this would force a defensive copy of x.
    io_aliases = {0: 0} if donate_x else {}

    out_flat = pl.pallas_call(
        kernel,
        out_shape=jax.ShapeDtypeStruct((B, C, HW), jnp.float32),
        grid=(B // bt,),
        in_specs=[
            pl.BlockSpec((bt, C, HW), lambda b: (b, 0, 0)),      # x slab (bt batches)
            pl.BlockSpec((C, hidden), lambda b: (0, 0)),         # w1^T
            pl.BlockSpec((1, hidden), lambda b: (0, 0)),         # b1
            pl.BlockSpec((C, hidden), lambda b: (0, 0)),         # w2 (stored layout)
            pl.BlockSpec((1, C), lambda b: (0, 0)),              # b2
        ],
        out_specs=pl.BlockSpec((bt, C, HW), lambda b: (b, 0, 0)),
        compiler_params=pltpu.CompilerParams(
            dimension_semantics=("parallel",),
            vmem_limit_bytes=vmem_limit,
        ),
        cost_estimate=pl.CostEstimate(
            flops=flops,
            transcendentals=B * C,          # sigmoid
            bytes_accessed=bytes_accessed,
        ),
        input_output_aliases=io_aliases,
    )(x_flat, w1t, b1_2d, w2, b2_2d)

    return out_flat.reshape(B, C, H, W)


se_block = jax.jit(_se_block_impl, static_argnames=("donate_x",))


def se_block_ref(x, w1, b1, w2, b2):
    """Pure-JAX reference mirroring the PyTorch forward."""
    y = jnp.mean(x, axis=(2, 3))                 # adaptive avg pool -> (B, C)
    y = jnp.maximum(y @ w1.T + b1, 0.0)          # Linear + ReLU
    y = jax.nn.sigmoid(y @ w2.T + b2)            # Linear + Sigmoid
    return x * y[:, :, None, None]


if __name__ == "__main__":
    # Module config: in_channels=8, reduction=4 -> hidden=2
    B, C, H, W = 2, 8, 16, 16
    reduction = 4
    hidden = C // reduction

    key = jax.random.PRNGKey(0)
    kx, kw1, kb1, kw2, kb2 = jax.random.split(key, 5)

    x = jax.random.normal(kx, (B, C, H, W), dtype=jnp.float32)
    w1 = jax.random.normal(kw1, (hidden, C), dtype=jnp.float32) * 0.1
    b1 = jax.random.normal(kb1, (hidden,), dtype=jnp.float32) * 0.1
    w2 = jax.random.normal(kw2, (C, hidden), dtype=jnp.float32) * 0.1
    b2 = jax.random.normal(kb2, (C,), dtype=jnp.float32) * 0.1

    # Case 1: HW a multiple of 128 (16*16 = 256).
    out = se_block(x, w1, b1, w2, b2)
    jax.block_until_ready(out)
    ref = se_block_ref(x, w1, b1, w2, b2)
    assert out.shape == (B, C, H, W)
    assert jnp.allclose(out, ref, atol=1e-5, rtol=1e-5), "mismatch vs reference"

    # Case 2: non-128-multiple spatial size (7*7 = 49) exercises the un-padded
    # full-HW block with masked trailing lanes in the pooled reduction.
    x2 = jax.random.normal(kx, (B, C, 7, 7), dtype=jnp.float32)
    out2 = se_block(x2, w1, b1, w2, b2)
    jax.block_until_ready(out2)
    ref2 = se_block_ref(x2, w1, b1, w2, b2)
    assert out2.shape == (B, C, 7, 7)
    assert jnp.allclose(out2, ref2, atol=1e-5, rtol=1e-5), "mismatch vs reference (7x7)"

    print("KERNEL_OK")
</pallas_src>

<mosaic_0001>
module attributes {stable_mosaic.version = 11 : i64} {
  func.func @_se_kernel(%arg0: i32, %arg1: memref<1x8x256xf32, #tpu.memory_space<vmem>>, %arg2: memref<8x2xf32, #tpu.memory_space<vmem>>, %arg3: memref<1x2xf32, #tpu.memory_space<vmem>>, %arg4: memref<8x2xf32, #tpu.memory_space<vmem>>, %arg5: memref<1x8xf32, #tpu.memory_space<vmem>>, %arg6: memref<1x8x256xf32, #tpu.memory_space<vmem>>) attributes {dimension_semantics = [#tpu.dimension_semantics<parallel>], iteration_bounds = array<i64: 2>, scalar_prefetch = 0 : i64, scratch_operands = 0 : i64, tpu.core_type = #tpu.core_type<tc>, window_params = [{transform_indices = @transform_0, window_bounds = array<i64: 1, 8, 256>}, {pipeline_mode = #tpu.pipeline_mode<synchronous>, transform_indices = @transform_1, window_bounds = array<i64: 8, 2>}, {pipeline_mode = #tpu.pipeline_mode<synchronous>, transform_indices = @transform_2, window_bounds = array<i64: 1, 2>}, {pipeline_mode = #tpu.pipeline_mode<synchronous>, transform_indices = @transform_3, window_bounds = array<i64: 8, 2>}, {pipeline_mode = #tpu.pipeline_mode<synchronous>, transform_indices = @transform_4, window_bounds = array<i64: 1, 8>}, {transform_indices = @transform_5, window_bounds = array<i64: 1, 8, 256>}]} {
    %c0 = arith.constant 0 : index
    %c0_0 = arith.constant 0 : index
    %c0_1 = arith.constant 0 : index
    %0 = vector.load %arg1[%c0, %c0_0, %c0_1] : memref<1x8x256xf32, #tpu.memory_space<vmem>>, vector<1x8x256xf32>
    %cst = arith.constant dense<0.000000e+00> : vector<1x8xf32>
    %1 = vector.multi_reduction <add>, %0, %cst [2] : vector<1x8x256xf32> to vector<1x8xf32>
    %cst_2 = arith.constant 3.906250e-03 : f32
    %2 = vector.broadcast %cst_2 : f32 to vector<1x8xf32>
    %3 = arith.mulf %1, %2 : vector<1x8xf32>
    %4 = vector.shape_cast %3 : vector<1x8xf32> to vector<1x8x1xf32>
    %c0_3 = arith.constant 0 : index
    %c0_4 = arith.constant 0 : index
    %5 = vector.load %arg2[%c0_3, %c0_4] : memref<8x2xf32, #tpu.memory_space<vmem>>, vector<8x2xf32>
    %6 = vector.shape_cast %5 : vector<8x2xf32> to vector<1x8x2xf32>
    %7 = vector.broadcast %4 : vector<1x8x1xf32> to vector<1x8x2xf32>
    %8 = arith.mulf %7, %6 : vector<1x8x2xf32>
    %cst_5 = arith.constant dense<0.000000e+00> : vector<1x2xf32>
    %9 = vector.multi_reduction <add>, %8, %cst_5 [1] : vector<1x8x2xf32> to vector<1x2xf32>
    %c0_6 = arith.constant 0 : index
    %c0_7 = arith.constant 0 : index
    %10 = vector.load %arg3[%c0_6, %c0_7] : memref<1x2xf32, #tpu.memory_space<vmem>>, vector<1x2xf32>
    %11 = arith.addf %9, %10 : vector<1x2xf32>
    %cst_8 = arith.constant 0.000000e+00 : f32
    %12 = vector.broadcast %cst_8 : f32 to vector<1x2xf32>
    %13 = arith.maximumf %11, %12 : vector<1x2xf32>
    %14 = vector.shape_cast %13 : vector<1x2xf32> to vector<1x1x2xf32>
    %c0_9 = arith.constant 0 : index
    %c0_10 = arith.constant 0 : index
    %15 = vector.load %arg4[%c0_9, %c0_10] : memref<8x2xf32, #tpu.memory_space<vmem>>, vector<8x2xf32>
    %16 = vector.shape_cast %15 : vector<8x2xf32> to vector<1x8x2xf32>
    %17 = vector.broadcast %14 : vector<1x1x2xf32> to vector<1x8x2xf32>
    %18 = arith.mulf %17, %16 : vector<1x8x2xf32>
    %cst_11 = arith.constant dense<0.000000e+00> : vector<1x8xf32>
    %19 = vector.multi_reduction <add>, %18, %cst_11 [2] : vector<1x8x2xf32> to vector<1x8xf32>
    %c0_12 = arith.constant 0 : index
    %c0_13 = arith.constant 0 : index
    %20 = vector.load %arg5[%c0_12, %c0_13] : memref<1x8xf32, #tpu.memory_space<vmem>>, vector<1x8xf32>
    %21 = arith.addf %19, %20 : vector<1x8xf32>
    %22 = arith.negf %21 : vector<1x8xf32>
    %23 = math.exp %22 : vector<1x8xf32>
    %cst_14 = arith.constant 1.000000e+00 : f32
    %24 = vector.broadcast %cst_14 : f32 to vector<1x8xf32>
    %25 = arith.addf %24, %23 : vector<1x8xf32>
    %26 = arith.divf %24, %25 : vector<1x8xf32>
    %27 = vector.shape_cast %26 : vector<1x8xf32> to vector<1x8x1xf32>
    %28 = vector.broadcast %27 : vector<1x8x1xf32> to vector<1x8x256xf32>
    %29 = arith.mulf %0, %28 : vector<1x8x256xf32>
    %c0_15 = arith.constant 0 : index
    %c0_16 = arith.constant 0 : index
    %c0_17 = arith.constant 0 : index
    %30 = vector.load %arg6[%c0_15, %c0_16, %c0_17] : memref<1x8x256xf32, #tpu.memory_space<vmem>>, vector<1x8x256xf32>
    tpu.vector_store %arg6[%c0_15, %c0_16, %c0_17], %29 {strides = array<i32>} : memref<1x8x256xf32, #tpu.memory_space<vmem>>, vector<1x8x256xf32>,
    return
  }
  func.func @transform_0(%arg0: i32) -> (i32, i32, i32) {
    %c0_i32 = arith.constant 0 : i32
    %c0_i32_0 = arith.constant 0 : i32
    %c0_i32_1 = arith.constant 0 : i32
    return %arg0, %c0_i32, %c0_i32_0 : i32, i32, i32
  }
  func.func @transform_1(%arg0: i32) -> (i32, i32) {
    %c0_i32 = arith.constant 0 : i32
    %c0_i32_0 = arith.constant 0 : i32
    %c0_i32_1 = arith.constant 0 : i32
    return %c0_i32, %c0_i32_0 : i32, i32
  }
  func.func @transform_2(%arg0: i32) -> (i32, i32) {
    %c0_i32 = arith.constant 0 : i32
    %c0_i32_0 = arith.constant 0 : i32
    %c0_i32_1 = arith.constant 0 : i32
    return %c0_i32, %c0_i32_0 : i32, i32
  }
  func.func @transform_3(%arg0: i32) -> (i32, i32) {
    %c0_i32 = arith.constant 0 : i32
    %c0_i32_0 = arith.constant 0 : i32
    %c0_i32_1 = arith.constant 0 : i32
    return %c0_i32, %c0_i32_0 : i32, i32
  }
  func.func @transform_4(%arg0: i32) -> (i32, i32) {
    %c0_i32 = arith.constant 0 : i32
    %c0_i32_0 = arith.constant 0 : i32
    %c0_i32_1 = arith.constant 0 : i32
    return %c0_i32, %c0_i32_0 : i32, i32
  }
  func.func @transform_5(%arg0: i32) -> (i32, i32, i32) {
    %c0_i32 = arith.constant 0 : i32
    %c0_i32_0 = arith.constant 0 : i32
    %c0_i32_1 = arith.constant 0 : i32
    return %arg0, %c0_i32, %c0_i32_0 : i32, i32, i32
  }
}

</mosaic_0001>

<bundles_post_ra>
// kernel: _se_block_impl.1
= control target key start
LH: loop header
LB: loop body
LE: loop exit
PB: predicated region body
PF: predicated region fallthrough
CT: control target
= control target key end

     0   :  { %s403_s18 = smov 0   ;;  %s441_s0 = inlined_call_operand.vmem [shape: f32[2,8,256], index: 0, kind: input, shape index: {}]   ;;  %s442_s1 = inlined_call_operand.vmem [shape: f32[8,2], index: 1, kind: input, shape index: {}]   ;;  %s443_s2 = inlined_call_operand.vmem [shape: f32[1,2], index: 2, kind: input, shape index: {}]   ;;  %s444_s3 = inlined_call_operand.vmem [shape: f32[8,2], index: 3, kind: input, shape index: {}]   ;;  %s445_s4 = inlined_call_operand.vmem [shape: f32[1,8], index: 4, kind: input, shape index: {}]   ;;  %s446_s5 = inlined_call_operand.vmem [shape: f32[2,8,256], index: 5, kind: output, shape index: {}]  }
   0x1 LB: > { %s334_s19 = sadd.s32 4294967295, %s370_s18   ;;  %p338_p0 = scmp.ge.s32.totalorder %s370_s18, 1  ;;  %s370_s18 = sphi %s403_s18, %s15_s18  }
   0x2   : > { %p187_p1 = scmp.lt.s32.totalorder %s370_s18, 3 }
   0x4   : > { %p188_p2 = pnand %p338_p0, %p187_p1 }
   0x5   : > { %p215_p3 = scmp.lt.s32.totalorder (!%p188_p2), %s334_s19, 1  ;;  %v343_v3 = vld [vmem:[%s445_s4] ss:$0 sm:$0xff] (!%p188_p2)  ;;  %vm233_vm0 = vcmask (!%p188_p2), 15360   ;;  %v245_v12 = vlaneseq (!%p188_p2)  ;;  %v372_v25 = vmov (!%p188_p2), 0  }
   0x6   : > { %191 = sbr.rel (%p188_p2) target bundleno = 488 (0x1e8), region = 40  ;;  %260 = vbcast.lane.b32.xlu1 (!%p188_p2), %v343_v3, 256  ;;  %v231_v4 = vld [vmem:[%s442_s1] sm:$0xff] (!%p188_p2)  ;;  %359 = vset.pattern.permute.xlu0 (!%p188_p2), %v372_v25 }
   0x7   : > { %v246_v15 = vshrl.u32 (!%p188_p2), %v245_v12, 7  ;;  %v241_v16 = vld [vmem:[%s443_s2] sm:$0x1] (!%p188_p2)  ;;  %358 = vset.pattern.permute.xlu1 (!%p188_p2), %v372_v25 }
   0x8   : > { %v244_v21 = vld [vmem:[%s444_s3] sm:$0xff] (!%p188_p2) }
   0x9   : > { %v247_v19 = vsub.s32 (!%p188_p2), 0, %v246_v15 }
   0xd   : > { %s448_s19 = smov (!%p215_p3, %s334_s19), 1 }
   0xe   : > { %s347_s20 = sshll.u32 %s448_s19, 4 }
   0xf   : > { %s219_s23 = scalar_lea.vmem %s441_s0, %s347_s20  ;;  %s224_s9 = scalar_lea.vmem %s446_s5, %s347_s20 }
  0x10   : > { %v225_v0 = vld [vmem:[%s219_s23] sm:$0xff]  ;;  %v226_v1 = vld [vmem:[%s219_s23 + $0x8] sm:$0xff] }
  0x11   : > { %v227_v2 = vadd.f32 %v226_v1, %v225_v0 }
  0x13   : > { %228 = vadd.xlane.f32.xlu0 %v227_v2 }
  0x78   : > { %v261_v26 = vpop.permute.xlu1 %260 }
  0xa0   : > { %v229_v5 = vpop.xlane.xlu0 %228 }
  0xa1   : > { %v230_v6 = vmul.f32 0.00390625, %v229_v5 }
  0xa3   : > { %v232_v7 = vmul.f32 %v231_v4, %v230_v6 }
  0xa5   : > { %v234_v8 = vsel %vm233_vm0, %v232_v7, 0.0 }
  0xa6   : > { %v235_v9 = vrot.slane %v234_v8, 4 }
  0xa8   : > { %v236_v10 = vadd.f32 %v235_v9, %v234_v8 }
  0xaa   : > { %v237_v11 = vrot.slane %v236_v10, 2 }
  0xac   : > { %v238_v13 = vadd.f32 %v237_v11, %v236_v10 }
  0xae   : > { %v239_v14 = vrot.slane %v238_v13, 1 }
  0xb0   : > { %v240_v17 = vadd.f32 %v239_v14, %v238_v13 }
  0xb2   : > { %v242_v18 = vadd.f32 %v241_v16, %v240_v17 }
  0xb4   : > { %v243_v20 = vmax.f32 %v242_v18, 0.0 }
  0xb6   : > { %v248_v22 = vrot.slane %v243_v20, %v247_v19 }
  0xb8   : > { %v249_v23 = vmul.f32 %v248_v22, %v244_v21 }
  0xba   : > { %v250_v24 = vsel %vm233_vm0, %v249_v23, 0.0 }
  0xbb   : > { %251 = vadd.xlane.f32.xlu0 %v250_v24 }
 0x148   : > { %v252_v27 = vpop.xlane.xlu0 %251 }
 0x149   : > { %v263_v28 = vadd.f32 %v261_v26, %v252_v27 }
 0x14b   : > { %v344_v29 = vmul.f32 -1.442695, %v263_v28 }
 0x14d   : > { %360 = vpow2.f32 %v344_v29 }
 0x157   : > { %v361_v30 = vpop.eup %360 }
 0x158   : > { %v267_v31 = vadd.f32 1.0, %v361_v30 }
 0x15a   : > { %362 = vrcp.f32 %v267_v31 }
 0x164   : > { %v363_v32 = vpop.eup %362 }
 0x165   : > { %272 = vperm.xlu1 %358, %v363_v32  }
 0x1e4   : > { %v273_v33 = vpop.permute.xlu1 %272 }
 0x1e5   : > { %v275_v34 = vmul.f32 %v273_v33, %v225_v0  ;;  %v276_v35 = vmul.f32 %v273_v33, %v226_v1 }
 0x1e7   : > { %277 = vst [vmem:[%s224_s9] sm:$0xff] %v275_v34  ;;  %278 = vst [vmem:[%s224_s9 + $0x8] sm:$0xff] %v276_v35 }
 0x1e8 PF: > { %s15_s18 = sadd.s32 1, %s370_s18  }
 0x1e9   : > { %p12_p4 = scmp.ge.s32.totalorder %s15_s18, 4  }
 0x1eb   :  { %14 = sbr.rel (!%p12_p4) target bundleno = 1 (0x1), region = 70 }

</bundles_post_ra>
